<compile_context>
chip_gen: v5e
topology: v5e:2x2
jax: 0.10.0
libtpu: 0.0.40
codegen_flags: <defaults>
</compile_context>

<pallas_src>
import functools
import math

import jax
import jax.numpy as jnp
from jax.experimental import pallas as pl
from jax.experimental.pallas import tpu as pltpu


def _round_up(x, m):
    return ((x + m - 1) // m) * m


def _apply_activation(y, activation):
    if activation == "tanh":
        return jnp.tanh(y)
    if activation == "relu":
        return jnp.maximum(y, 0.0)
    if activation == "sigmoid":
        return jax.nn.sigmoid(y)
    if activation == "gelu":
        # torch.nn.GELU default is the exact erf form.
        return jax.nn.gelu(y, approximate=False)
    if activation == "lrelu":
        return jnp.where(y >= 0.0, y, 0.01 * y)  # torch LeakyReLU default slope
    raise ValueError(f"unknown activation {activation!r}")


# ----------------------------------------------------------------------------
# Fused kernel for one group of layers.  grid = (M tiles,).  All weights of
# the group are resident in VMEM (constant index_map); the activation tile
# never leaves VMEM between layers.
#   refs = (x_ref, w0, b0, w1, b1, ..., o_ref)
# ----------------------------------------------------------------------------
def _mlp_group_kernel(*refs, activation, mask_cols):
    x_ref, o_ref = refs[0], refs[-1]
    wb_refs = refs[1:-1]
    n_layers = len(wb_refs) // 2

    h = x_ref[...].astype(jnp.float32)                     # (tm, Kp0)
    for i in range(n_layers):
        w = wb_refs[2 * i][...]                            # (Kp_i, Np_i)
        b = wb_refs[2 * i + 1][...].astype(jnp.float32)    # (1, Np_i)
        # bf16 x bf16 -> f32 accumulate on the MXU (or f32 x f32 if requested).
        y = jnp.dot(h.astype(w.dtype), w, preferred_element_type=jnp.float32)
        y = _apply_activation(y + b, activation)
        # Padded weight rows are zero, so padded activation columns never
        # contribute to the next layer; masking is only kept (cheap, rare)
        # for sigmoid with ragged widths as belt-and-braces.
        if mask_cols[i] is not None:
            col = jax.lax.broadcasted_iota(jnp.int32, y.shape, 1)
            y = jnp.where(col < mask_cols[i], y, 0.0)
        h = y
    o_ref[...] = h.astype(o_ref.dtype)


# ----------------------------------------------------------------------------
# Wrapper: per-layer padding, generation-aware VMEM/tm selection, one fused
# pallas_call per VMEM-fitting group of layers (usually a single call).
# ----------------------------------------------------------------------------
def mlp_forward(x, params, activation="tanh", *, tm=512, weight_dtype=jnp.bfloat16):
    """x: (..., in_dim) -> (..., h_dims[-1])."""
    lead = x.shape[:-1]
    in_dim = x.shape[-1]
    dims = [in_dim] + [w.shape[1] for (w, _) in params]
    out_dim = dims[-1]
    L = len(params)
    dims_p = [_round_up(d, 128) for d in dims]             # per-layer padded widths

    x2 = x.reshape(-1, in_dim).astype(jnp.float32)
    M = x2.shape[0]

    wdt = jnp.float32 if weight_dtype is None else weight_dtype
    wbytes = jnp.dtype(wdt).itemsize

    # ---- generation-aware VMEM budget -------------------------------------
    try:
        vmem_cap = int(pltpu.get_tpu_info().vmem_capacity_bytes)
    except Exception:                                      # pragma: no cover
        vmem_cap = 64 << 20                                # conservative (v7x)
    budget = int(0.7 * vmem_cap)                           # ~45 MiB v7x, ~90 MiB v5e/v6e

    # ---- batch tile selection ----------------------------------------------
    tm = min(tm, _round_up(max(M, 1), 8))
    if M >= 16:
        # Keep >= 2 parallel M tiles so v7x's two TensorCores both get work.
        tm = min(tm, _round_up((M + 1) // 2, 8))
    tm = max(8, _round_up(tm, 8))

    # ---- group consecutive layers that fit (resident) in VMEM --------------
    def wb_group_bytes(lo, hi):
        # double-buffered weight + bias blocks for layers [lo, hi)
        return sum(2 * (dims_p[i] * dims_p[i + 1] * wbytes + dims_p[i + 1] * 4)
                   for i in range(lo, hi))

    def act_bytes(lo, hi, t):
        # input/output double buffers + live intermediates (rough upper bound)
        dmax = max(dims_p[lo:hi + 1])
        return 4 * t * (2 * dims_p[lo] + 2 * dims_p[hi] + 3 * dmax)

    groups = []
    lo = 0
    while lo < L:
        hi = lo + 1
        while hi < L and wb_group_bytes(lo, hi + 1) + act_bytes(lo, hi + 1, 8) <= budget:
            hi += 1
        groups.append((lo, hi))
        lo = hi

    def total_est(t):
        return max(wb_group_bytes(g0, g1) + act_bytes(g0, g1, t) for (g0, g1) in groups)

    while tm > 8 and total_est(tm) > budget:
        tm = max(8, _round_up(tm // 2, 8))

    Mp = _round_up(max(M, 1), tm)
    vmem_limit = int(min(max(total_est(tm) + (8 << 20), 32 << 20),
                         vmem_cap - (2 << 20)))

    # ---- run one fused call per group --------------------------------------
    cur = jnp.zeros((Mp, dims_p[0]), jnp.float32).at[:M, :in_dim].set(x2)

    for (g_lo, g_hi) in groups:
        args = [cur]
        in_specs = [pl.BlockSpec((tm, dims_p[g_lo]), lambda i: (i, 0))]
        mask_cols = []
        for li in range(g_lo, g_hi):
            w, b = params[li]
            k, n = w.shape
            Kp, Np = dims_p[li], dims_p[li + 1]
            w_p = jnp.zeros((Kp, Np), wdt).at[:k, :n].set(w.astype(wdt))
            b_p = jnp.zeros((1, Np), jnp.float32).at[0, :n].set(b.astype(jnp.float32))
            args += [w_p, b_p]
            # Whole-array blocks with constant index_map: loaded once, resident.
            in_specs += [pl.BlockSpec((Kp, Np), lambda i: (0, 0)),
                         pl.BlockSpec((1, Np), lambda i: (0, 0))]
            needs_mask = (activation == "sigmoid") and (n < Np) and (li != L - 1)
            mask_cols.append(n if needs_mask else None)

        Np_out = dims_p[g_hi]
        kernel = functools.partial(_mlp_group_kernel,
                                   activation=activation,
                                   mask_cols=tuple(mask_cols))
        cur = pl.pallas_call(
            kernel,
            out_shape=jax.ShapeDtypeStruct((Mp, Np_out), jnp.float32),
            grid_spec=pltpu.PrefetchScalarGridSpec(
                num_scalar_prefetch=0,
                grid=(Mp // tm,),
                in_specs=in_specs,
                out_specs=pl.BlockSpec((tm, Np_out), lambda i: (i, 0)),
            ),
            compiler_params=pltpu.CompilerParams(
                dimension_semantics=("parallel",),
                vmem_limit_bytes=vmem_limit,
            ),
        )(*args)

    out = cur[:M, :out_dim]
    return out.reshape(*lead, out_dim)


# ----------------------------------------------------------------------------
# Parameter init (nn.Linear-style) + pure-JAX reference for testing.
# ----------------------------------------------------------------------------
def init_mlp_params(key, in_dim, h_dims):
    """U(-1/sqrt(fan_in), 1/sqrt(fan_in)) for W and b; W stored (in, out)."""
    params = []
    d_in = in_dim
    for h in h_dims:
        key, kw, kb = jax.random.split(key, 3)
        bound = 1.0 / math.sqrt(d_in)
        w = jax.random.uniform(kw, (d_in, h), jnp.float32, -bound, bound)
        b = jax.random.uniform(kb, (h,), jnp.float32, -bound, bound)
        params.append((w, b))
        d_in = h
    return params


def _ref_forward(x, params, activation):
    for w, b in params:
        x = _apply_activation(x @ w + b, activation)
    return x


if __name__ == "__main__":
    key = jax.random.PRNGKey(0)
    k_x, k_p1, k_p2 = jax.random.split(key, 3)

    # Canonical MLP(in_dim=32, h_dims=[128, 128], tanh); batch=6 exercises
    # non-multiple-of-8 row padding.
    in_dim, h_dims, batch = 32, [128, 128], 6
    x = jax.random.normal(k_x, (batch, in_dim), jnp.float32)
    params = init_mlp_params(k_p1, in_dim, h_dims)
    ref = _ref_forward(x, params, "tanh")

    # Case 1: exact f32 path (validates kernel logic tightly).
    out_f32 = mlp_forward(x, params, activation="tanh", weight_dtype=jnp.float32)
    jax.block_until_ready(out_f32)
    assert out_f32.shape == (batch, h_dims[-1])
    assert jnp.allclose(out_f32, ref, atol=1e-5, rtol=1e-5), "f32 tanh MLP mismatch"

    # Case 2: default bf16 matmul path (MXU-native; looser tolerance vs f32 ref).
    out_bf16 = mlp_forward(x, params, activation="tanh")
    jax.block_until_ready(out_bf16)
    assert out_bf16.shape == (batch, h_dims[-1])
    assert jnp.allclose(out_bf16, ref, atol=5e-2, rtol=0.0), "bf16 tanh MLP mismatch"

    # Case 3: ragged hidden dims + sigmoid (exercises the kept sigmoid mask),
    # exact f32 path.
    h_dims2 = [96, 64]
    params2 = init_mlp_params(k_p2, in_dim, h_dims2)
    out2 = mlp_forward(x, params2, activation="sigmoid", weight_dtype=jnp.float32)
    jax.block_until_ready(out2)
    ref2 = _ref_forward(x, params2, "sigmoid")
    assert out2.shape == (batch, h_dims2[-1])
    assert jnp.allclose(out2, ref2, atol=1e-5, rtol=1e-5), "sigmoid MLP mismatch"

    print("KERNEL_OK")
</pallas_src>

<mosaic_0001>
module attributes {stable_mosaic.version = 11 : i64} {
  func.func @_mlp_group_kernel(%arg0: i32, %arg1: memref<8x128xf32, #tpu.memory_space<vmem>>, %arg2: memref<128x128xf32, #tpu.memory_space<vmem>>, %arg3: memref<1x128xf32, #tpu.memory_space<vmem>>, %arg4: memref<128x128xf32, #tpu.memory_space<vmem>>, %arg5: memref<1x128xf32, #tpu.memory_space<vmem>>, %arg6: memref<8x128xf32, #tpu.memory_space<vmem>>) attributes {dimension_semantics = [#tpu.dimension_semantics<parallel>], iteration_bounds = array<i64: 1>, scalar_prefetch = 0 : i64, scratch_operands = 0 : i64, tpu.core_type = #tpu.core_type<tc>, window_params = [{transform_indices = @transform_0, window_bounds = array<i64: 8, 128>}, {pipeline_mode = #tpu.pipeline_mode<synchronous>, transform_indices = @transform_1, window_bounds = array<i64: 128, 128>}, {pipeline_mode = #tpu.pipeline_mode<synchronous>, transform_indices = @transform_2, window_bounds = array<i64: 1, 128>}, {pipeline_mode = #tpu.pipeline_mode<synchronous>, transform_indices = @transform_3, window_bounds = array<i64: 128, 128>}, {pipeline_mode = #tpu.pipeline_mode<synchronous>, transform_indices = @transform_4, window_bounds = array<i64: 1, 128>}, {transform_indices = @transform_5, window_bounds = array<i64: 8, 128>}]} {
    %c0 = arith.constant 0 : index
    %c0_0 = arith.constant 0 : index
    %0 = vector.load %arg1[%c0, %c0_0] : memref<8x128xf32, #tpu.memory_space<vmem>>, vector<8x128xf32>
    %c0_1 = arith.constant 0 : index
    %c0_2 = arith.constant 0 : index
    %1 = vector.load %arg2[%c0_1, %c0_2] : memref<128x128xf32, #tpu.memory_space<vmem>>, vector<128x128xf32>
    %c0_3 = arith.constant 0 : index
    %c0_4 = arith.constant 0 : index
    %2 = vector.load %arg3[%c0_3, %c0_4] : memref<1x128xf32, #tpu.memory_space<vmem>>, vector<1x128xf32>
    %cst = arith.constant dense<0.000000e+00> : vector<8x128xf32>
    %3 = tpu.matmul %0, %1, %cst {dimension_numbers = #tpu.dot_dimension_numbers<[1], [0], [0], [1], [0, 0, 1, 1], [], []>} : vector<8x128xf32>, vector<128x128xf32>, vector<8x128xf32> -> vector<8x128xf32>
    %4 = vector.broadcast %2 : vector<1x128xf32> to vector<8x128xf32>
    %5 = arith.addf %3, %4 : vector<8x128xf32>
    %6 = math.tanh %5 : vector<8x128xf32>
    %c0_5 = arith.constant 0 : index
    %c0_6 = arith.constant 0 : index
    %7 = vector.load %arg4[%c0_5, %c0_6] : memref<128x128xf32, #tpu.memory_space<vmem>>, vector<128x128xf32>
    %c0_7 = arith.constant 0 : index
    %c0_8 = arith.constant 0 : index
    %8 = vector.load %arg5[%c0_7, %c0_8] : memref<1x128xf32, #tpu.memory_space<vmem>>, vector<1x128xf32>
    %cst_9 = arith.constant dense<0.000000e+00> : vector<8x128xf32>
    %9 = tpu.matmul %6, %7, %cst_9 {dimension_numbers = #tpu.dot_dimension_numbers<[1], [0], [0], [1], [0, 0, 1, 1], [], []>} : vector<8x128xf32>, vector<128x128xf32>, vector<8x128xf32> -> vector<8x128xf32>
    %10 = vector.broadcast %8 : vector<1x128xf32> to vector<8x128xf32>
    %11 = arith.addf %9, %10 : vector<8x128xf32>
    %12 = math.tanh %11 : vector<8x128xf32>
    %c0_10 = arith.constant 0 : index
    %c0_11 = arith.constant 0 : index
    %13 = vector.load %arg6[%c0_10, %c0_11] : memref<8x128xf32, #tpu.memory_space<vmem>>, vector<8x128xf32>
    tpu.vector_store %arg6[%c0_10, %c0_11], %12 {strides = array<i32>} : memref<8x128xf32, #tpu.memory_space<vmem>>, vector<8x128xf32>,
    return
  }
  func.func @transform_0(%arg0: i32) -> (i32, i32) {
    %c0_i32 = arith.constant 0 : i32
    %c0_i32_0 = arith.constant 0 : i32
    return %arg0, %c0_i32 : i32, i32
  }
  func.func @transform_1(%arg0: i32) -> (i32, i32) {
    %c0_i32 = arith.constant 0 : i32
    %c0_i32_0 = arith.constant 0 : i32
    %c0_i32_1 = arith.constant 0 : i32
    return %c0_i32, %c0_i32_0 : i32, i32
  }
  func.func @transform_2(%arg0: i32) -> (i32, i32) {
    %c0_i32 = arith.constant 0 : i32
    %c0_i32_0 = arith.constant 0 : i32
    %c0_i32_1 = arith.constant 0 : i32
    return %c0_i32, %c0_i32_0 : i32, i32
  }
  func.func @transform_3(%arg0: i32) -> (i32, i32) {
    %c0_i32 = arith.constant 0 : i32
    %c0_i32_0 = arith.constant 0 : i32
    %c0_i32_1 = arith.constant 0 : i32
    return %c0_i32, %c0_i32_0 : i32, i32
  }
  func.func @transform_4(%arg0: i32) -> (i32, i32) {
    %c0_i32 = arith.constant 0 : i32
    %c0_i32_0 = arith.constant 0 : i32
    %c0_i32_1 = arith.constant 0 : i32
    return %c0_i32, %c0_i32_0 : i32, i32
  }
  func.func @transform_5(%arg0: i32) -> (i32, i32) {
    %c0_i32 = arith.constant 0 : i32
    %c0_i32_0 = arith.constant 0 : i32
    return %arg0, %c0_i32 : i32, i32
  }
}

</mosaic_0001>

<bundles_post_ra>
// kernel: tpu_custom_call.1
= control target key start
LH: loop header
LB: loop body
LE: loop exit
PB: predicated region body
PF: predicated region fallthrough
CT: control target
= control target key end

     0   :  { %10 = vsyncpa [#allocation3], 0  ;;  %s336_s0 = inlined_call_operand.hbm [shape: f32[8,128], index: 0, kind: input, shape index: {}]   ;;  %s337_s1 = inlined_call_operand.hbm [shape: f32[128,128], index: 1, kind: input, shape index: {}]   ;;  %s338_s2 = inlined_call_operand.vmem [shape: f32[1,128], index: 2, kind: input, shape index: {}]   ;;  %s339_s3 = inlined_call_operand.hbm [shape: f32[128,128], index: 3, kind: input, shape index: {}]   ;;  %s340_s4 = inlined_call_operand.vmem [shape: f32[1,128], index: 4, kind: input, shape index: {}]   ;;  %s341_s5 = inlined_call_operand.hbm [shape: f32[8,128], index: 5, kind: output, shape index: {}]  }
   0x1   :  { %11 = vsyncpa [#allocation6], 0  ;;  %s28_s20 = sshll.u32 %s337_s1, 4  ;;  %s29_s20 = int_to_ptr.hbm [resolvable:$true] %s28_s20 }
   0x2   :  { %12 = vsyncpa [#allocation4], 0  ;;  %s282_s21 = smov [#allocation5]   ;;  %s18_s25 = sshll.u32 %s336_s0, 4  ;;  %s19_s25 = int_to_ptr.hbm [resolvable:$true] %s18_s25 }
   0x3   :  { %s30_s22 = sshll.u32 %s282_s21, 4  ;;  %s283_s26 = smov 128   ;;  %s31_s22 = int_to_ptr.vmem [resolvable:$true] %s30_s22 }
   0x4   :  { %s284_s27 = smov 8   ;;  %s285_s28 = smov [#allocation2]  }
   0x5   :  { %36 = dma.hbm_to_vmem [thread:$0]  %s29_s20, 2048, %s31_s22, [#allocation6], %s283_s26, %s283_s26, %s284_s27  }
   0x6   :  { %s20_s29 = sshll.u32 %s285_s28, 4  ;;  %s43_s7 = sshll.u32 %s339_s3, 4  ;;  %s21_s29 = int_to_ptr.vmem [resolvable:$true] %s20_s29  ;;  %s44_s7 = int_to_ptr.hbm [resolvable:$true] %s43_s7 }
   0x7   :  { %23 = dma.hbm_to_vmem [thread:$0]  %s19_s25, 128, %s21_s29, [#allocation3]  }
   0x8   :  { %s286_s1 = smov [#allocation7]  }
   0x9   :  { %s45_s8 = sshll.u32 %s286_s1, 4  ;;  %s46_s8 = int_to_ptr.vmem [resolvable:$true] %s45_s8 }
   0xa   :  { %51 = dma.hbm_to_vmem [thread:$0]  %s44_s7, 2048, %s46_s8, [#allocation6], %s283_s26, %s283_s26, %s284_s27  }
   0xb   :  { %276 = dma.done.wait [#allocation3], 128  }
   0xc   :  { %277 = vsyncadd [#allocation3], 4294967168 }
   0xd   :  { %278 = dma.done.wait [#allocation6], 4096  }
   0xe   :  { %279 = vsyncadd [#allocation6], 4294963200  ;;  %v82_v0 = vld [vmem:[#allocation5 + $0x78] sm:$0xff]  ;;  %v81_v1 = vld [vmem:[#allocation5 + $0x70] sm:$0xff]  ;;  %s287_s11 = smov [#allocation8]   ;;  %s157_s15 = sshll.u32 %s341_s5, 4  ;;  %s158_s15 = int_to_ptr.hbm [resolvable:$true] %s157_s15 }
   0xf   :  { %87 = vmatpush.msra.mxu0 %v82_v0  ;;  %v80_v2 = vld [vmem:[#allocation5 + $0x68] sm:$0xff]  ;;  %v79_v3 = vld [vmem:[#allocation5 + $0x60] sm:$0xff]  ;;  %v123_v4 = vld [vmem:[#allocation7 + $0x78] sm:$0xff]  ;;  %s155_s12 = sshll.u32 %s287_s11, 4  ;;  %s156_s12 = int_to_ptr.vmem [resolvable:$true] %s155_s12 }
  0x10   :  { %v78_v5 = vld [vmem:[#allocation5 + $0x58] sm:$0xff]  ;;  %128 = vmatpush.msra.mxu1 %v123_v4  ;;  %v122_v6 = vld [vmem:[#allocation7 + $0x70] sm:$0xff]  ;;  %v121_v7 = vld [vmem:[#allocation7 + $0x68] sm:$0xff] }
  0x11   :  { %88 = vmatpush.msra.mxu0 %v81_v1  ;;  %v77_v8 = vld [vmem:[#allocation5 + $0x50] sm:$0xff]  ;;  %v120_v9 = vld [vmem:[#allocation7 + $0x60] sm:$0xff]  ;;  %v76_v10 = vld [vmem:[#allocation5 + $0x48] sm:$0xff] }
  0x12   :  { %129 = vmatpush.msra.mxu1 %v122_v6  ;;  %v119_v11 = vld [vmem:[#allocation7 + $0x58] sm:$0xff]  ;;  %v75_v12 = vld [vmem:[#allocation5 + $0x40] sm:$0xff]  ;;  %v118_v13 = vld [vmem:[#allocation7 + $0x50] sm:$0xff] }
  0x13   :  { %89 = vmatpush.msra.mxu0 %v80_v2  ;;  %v74_v14 = vld [vmem:[#allocation5 + $0x38] sm:$0xff]  ;;  %v117_v15 = vld [vmem:[#allocation7 + $0x48] sm:$0xff]  ;;  %v73_v16 = vld [vmem:[#allocation5 + $0x30] sm:$0xff] }
  0x14   :  { %130 = vmatpush.msra.mxu1 %v121_v7  ;;  %v116_v17 = vld [vmem:[#allocation7 + $0x40] sm:$0xff]  ;;  %v72_v18 = vld [vmem:[#allocation5 + $0x28] sm:$0xff]  ;;  %v115_v19 = vld [vmem:[#allocation7 + $0x38] sm:$0xff] }
  0x15   :  { %90 = vmatpush.msra.mxu0 %v79_v3  ;;  %v71_v20 = vld [vmem:[#allocation5 + $0x20] sm:$0xff]  ;;  %v114_v21 = vld [vmem:[#allocation7 + $0x30] sm:$0xff]  ;;  %v70_v22 = vld [vmem:[#allocation5 + $0x18] sm:$0xff] }
  0x16   :  { %131 = vmatpush.msra.mxu1 %v120_v9  ;;  %v113_v23 = vld [vmem:[#allocation7 + $0x28] sm:$0xff]  ;;  %v69_v24 = vld [vmem:[#allocation5 + $0x10] sm:$0xff]  ;;  %v67_v26 = vld [vmem:[#allocation5] sm:$0xff] }
  0x17   :  { %91 = vmatpush.msra.mxu0 %v78_v5  ;;  %v68_v25 = vld [vmem:[#allocation5 + $0x8] sm:$0xff]  ;;  %v66_v27 = vld [vmem:[#allocation2] sm:$0xff]  ;;  %v112_v28 = vld [vmem:[#allocation7 + $0x20] sm:$0xff] }
  0x18   :  { %132 = vmatpush.msra.mxu1 %v119_v11  ;;  %v111_v29 = vld [vmem:[#allocation7 + $0x18] sm:$0xff]  ;;  %v110_v30 = vld [vmem:[#allocation7 + $0x10] sm:$0xff]  ;;  %v109_v31 = vld [vmem:[#allocation7 + $0x8] sm:$0xff] }
  0x19   :  { %92 = vmatpush.msra.mxu0 %v77_v8  ;;  %v108_v32 = vld [vmem:[#allocation7] sm:$0xff]  ;;  %v174_v33 = vld [vmem:[%s338_s2] ss:$0 sm:$0xff] }
  0x1a   :  { %133 = vmatpush.msra.mxu1 %v118_v13  ;;  %v175_v37 = vld [vmem:[%s340_s4] ss:$0 sm:$0xff] }
  0x1b   :  { %93 = vmatpush.msra.mxu0 %v76_v10 }
  0x1c   :  { %134 = vmatpush.msra.mxu1 %v117_v15 }
  0x1d   :  { %94 = vmatpush.msra.mxu0 %v75_v12 }
  0x1e   :  { %135 = vmatpush.msra.mxu1 %v116_v17 }
  0x1f   :  { %95 = vmatpush.msra.mxu0 %v74_v14 }
  0x20   :  { %136 = vmatpush.msra.mxu1 %v115_v19 }
  0x21   :  { %96 = vmatpush.msra.mxu0 %v73_v16 }
  0x22   :  { %137 = vmatpush.msra.mxu1 %v114_v21 }
  0x23   :  { %97 = vmatpush.msra.mxu0 %v72_v18 }
  0x24   :  { %138 = vmatpush.msra.mxu1 %v113_v23 }
  0x25   :  { %98 = vmatpush.msra.mxu0 %v71_v20 }
  0x26   :  { %139 = vmatpush.msra.mxu1 %v112_v28 }
  0x27   :  { %99 = vmatpush.msra.mxu0 %v70_v22 }
  0x28   :  { %140 = vmatpush.msra.mxu1 %v111_v29 }
  0x29   :  { %100 = vmatpush.msra.mxu0 %v69_v24 }
  0x2a   :  { %141 = vmatpush.msra.mxu1 %v110_v30 }
  0x2b   :  { %101 = vmatpush.msra.mxu0 %v68_v25 }
  0x2c   :  { %142 = vmatpush.msra.mxu1 %v109_v31 }
  0x2d   :  { %102 = vmatpush.msra.mxu0 %v67_v26 }
  0x2e   :  { %103 = vmatmul.f32.vlgmr.msra.gmra.mxu0 %v66_v27  ;;  %143 = vmatpush.msra.mxu1 %v108_v32 }
  0xab   :  { %v104_v34 = vpop.f32.mrf.mxu0 }
  0xac   :  { %v105_v35 = vadd.f32 %v174_v33, %v104_v34 }
  0xae   :  { %176 = vtanh.f32 %v105_v35 }
  0xb4   :  { %v177_v36 = vpop.eup %176 }
  0xb5   :  { %144 = vmatmul.f32.vlgmr.msra.gmra.mxu1 %v177_v36 }
 0x132   :  { %v145_v38 = vpop.f32.mrf.mxu1 }
 0x133   :  { %v146_v39 = vadd.f32 %v175_v37, %v145_v38 }
 0x135   :  { %178 = vtanh.f32 %v146_v39 }
 0x13b   :  { %v179_v40 = vpop.eup %178 }
 0x13c   :  { %149 = vst [vmem:[#allocation8] sm:$0xff] %v179_v40 }
 0x13d   :  { %160 = dma.vmem_to_hbm [thread:$0]  %s156_s12, 128, %s158_s15, [#allocation4]  }
 0x13e   :  { %280 = dma.done.wait [#allocation4], 128  }
 0x13f   :  { %281 = vsyncadd [#allocation4], 4294967168 }
 0x140   :  { %165 = vsyncpa [#allocation3], 1 }
 0x141   :  { %166 = vsyncpa [#allocation6], 1 }
 0x142   :  { %167 = vsyncpa [#allocation4], 1 }

</bundles_post_ra>
